<compile_context>
chip_gen: v6e
topology: v6e:2x2x1
jax: 0.10.0
libtpu: 0.0.40
codegen_flags: <defaults>
</compile_context>

<pallas_src>
import jax
import jax.numpy as jnp
from jax import lax
from jax.experimental import pallas as pl
from jax.experimental.pallas import tpu as pltpu

EPS = 1e-5          # nn.BatchNorm2d default eps
NEG_SLOPE = 0.2     # nn.LeakyReLU(0.2)


def _round_up(x, m):
    return (x + m - 1) // m * m


# --------------------------------- kernels ---------------------------------------------

def _write_stats(stats_ref, y):
    # stats_ref: (1, 2, Cp) f32; row 0 = per-channel sum, row 1 = per-channel sum-of-squares
    stats_ref[0, 0:1, :] = jnp.sum(y, axis=0, keepdims=True)
    stats_ref[0, 1:2, :] = jnp.sum(y * y, axis=0, keepdims=True)


def conv_store_kernel(p_ref, w_ref, y_ref, stats_ref):
    """Pass 1 (store-y): conv matmul + BN partial sums; y written back in bf16."""
    y = jnp.dot(p_ref[...], w_ref[...], preferred_element_type=jnp.float32)
    _write_stats(stats_ref, y)
    y_ref[...] = y.astype(y_ref.dtype)


def conv_stats_kernel(p_ref, w_ref, stats_ref):
    """Pass 1 (recompute): BN partial sums only; y is recomputed in pass 2."""
    y = jnp.dot(p_ref[...], w_ref[...], preferred_element_type=jnp.float32)
    _write_stats(stats_ref, y)


def bn_lrelu_kernel(y_ref, scale_ref, shift_ref, o_ref):
    """Pass 2 (store-y): z = y*scale + shift, LeakyReLU(0.2); bf16 in, bf16 out (aliased)."""
    z = y_ref[...].astype(jnp.float32) * scale_ref[...] + shift_ref[...]
    o_ref[...] = jnp.where(z >= 0.0, z, NEG_SLOPE * z).astype(o_ref.dtype)


def conv_bn_lrelu_kernel(p_ref, w_ref, scale_ref, shift_ref, o_ref):
    """Pass 2 (recompute): conv matmul fused with BN affine + LeakyReLU(0.2)."""
    y = jnp.dot(p_ref[...], w_ref[...], preferred_element_type=jnp.float32)
    z = y * scale_ref[...] + shift_ref[...]
    o_ref[...] = jnp.where(z >= 0.0, z, NEG_SLOPE * z).astype(o_ref.dtype)


# --------------------------------- wrapper ----------------------------------------------

def unet_block_down(x, weight, bias, gamma, beta, *,
                    kernel_size=3, stride=2, pad=1,
                    tm=None, vmem_budget_bytes=12 << 20, vmem_limit_bytes=None,
                    recompute=None, input_nhwc=False, output_nhwc=False):
    """Forward of UNetBlock(down=True).

    x: (N, Cin, H, W) f32 (or NHWC if input_nhwc=True) -> (N, Cout, Ho, Wo) f32
    (or NHWC if output_nhwc=True).
    """
    del bias  # mathematically cancelled by training-mode BatchNorm's mean subtraction

    if not input_nhwc:
        x = jnp.transpose(x, (0, 2, 3, 1))          # NCHW -> NHWC (skip when chaining NHWC)
    N, H, W, Cin = x.shape
    Cout = weight.shape[0]
    KH = KW = kernel_size
    Ho = (H + 2 * pad - KH) // stride + 1
    Wo = (W + 2 * pad - KW) // stride + 1
    M = N * Ho * Wo
    K = KH * KW * Cin
    Cp = _round_up(Cout, 128)                       # lane-dense output / MXU N dim
    Kp = _round_up(K, 128)                          # lane-dense contraction dim

    # ---- tile-size choice: multiple of 256 (MXU tile), VMEM-budgeted (v5e-safe default).
    if tm is None:
        tm = 1024
        while tm > 256:
            working_set = (2 * tm * Kp * 2          # double-buffered patches block (bf16)
                           + Kp * Cp * 2            # resident weight (bf16)
                           + 2 * tm * Cp * 2        # double-buffered y/out block (bf16)
                           + 2 * 2 * Cp * 4)        # stats block (f32)
            if working_set <= vmem_budget_bytes:
                break
            tm //= 2
    tm = min(max(256, _round_up(tm, 256)), _round_up(M, 256))
    M_pad = _round_up(M, tm)
    num_m = M_pad // tm
    # NOTE: on v7x (2 TensorCores) an even num_m keeps both cores busy; tune tm per layer.

    if recompute is None:
        # Recompute the matmul in pass 2 (never materialize y) when re-reading the patches
        # tile is no more expensive than a y round-trip.  Deep / MXU-bound layers (large K,
        # v7x) should keep the store-y path.
        recompute = Kp <= Cp

    # ---- im2col (XLA glue, bf16, K padded to Kp; zero rows/cols contribute 0 to BN sums).
    xp = jnp.pad(x.astype(jnp.bfloat16), ((0, 0), (pad, pad), (pad, pad), (0, 0)))
    cols = []
    for dh in range(KH):
        for dw in range(KW):
            cols.append(xp[:, dh:dh + stride * (Ho - 1) + 1:stride,
                           dw:dw + stride * (Wo - 1) + 1:stride, :])
    patches = jnp.stack(cols, axis=3).reshape(M, K)
    patches = jnp.pad(patches, ((0, M_pad - M), (0, Kp - K)))

    # PyTorch weight (Cout, Cin, KH, KW) -> (K, Cout) -> pad to (Kp, Cp), bf16.
    wmat = jnp.transpose(weight, (2, 3, 1, 0)).reshape(K, Cout)
    wmat = jnp.pad(wmat, ((0, Kp - K), (0, Cp - Cout))).astype(jnp.bfloat16)

    cp_kwargs = dict(dimension_semantics=("parallel",))
    if vmem_limit_bytes is not None:
        cp_kwargs["vmem_limit_bytes"] = vmem_limit_bytes
    cparams = pltpu.CompilerParams(**cp_kwargs)

    p_spec = pl.BlockSpec((tm, Kp), lambda i: (i, 0))
    w_spec = pl.BlockSpec((Kp, Cp), lambda i: (0, 0))       # weight stays VMEM-resident
    stats_spec = pl.BlockSpec((1, 2, Cp), lambda i: (i, 0, 0))
    stats_shape = jax.ShapeDtypeStruct((num_m, 2, Cp), jnp.float32)
    matmul_cost = pl.CostEstimate(
        flops=2 * M_pad * Kp * Cp, transcendentals=0,
        bytes_accessed=M_pad * Kp * 2 + Kp * Cp * 2 + M_pad * Cp * 2)

    # ---- Pass 1: conv matmul + per-tile BN partial sums --------------------------------
    if recompute:
        stats = pl.pallas_call(
            conv_stats_kernel,
            out_shape=stats_shape,
            grid=(num_m,),
            in_specs=[p_spec, w_spec],
            out_specs=stats_spec,
            compiler_params=cparams,
            cost_estimate=matmul_cost,
        )(patches, wmat)
        y = None
    else:
        y, stats = pl.pallas_call(
            conv_store_kernel,
            out_shape=(jax.ShapeDtypeStruct((M_pad, Cp), jnp.bfloat16), stats_shape),
            grid=(num_m,),
            in_specs=[p_spec, w_spec],
            out_specs=(pl.BlockSpec((tm, Cp), lambda i: (i, 0)), stats_spec),
            compiler_params=cparams,
            cost_estimate=matmul_cost,
        )(patches, wmat)

    # ---- Tiny cross-tile reduction + fold BN affine into per-channel scale/shift (f32) --
    total = jnp.sum(stats[:, 0, :], axis=0)
    total_sq = jnp.sum(stats[:, 1, :], axis=0)
    m_count = jnp.float32(M)                        # true row count (padded rows are zero)
    mean = total / m_count
    var = jnp.maximum(total_sq / m_count - mean * mean, 0.0)
    gamma_p = jnp.pad(gamma.astype(jnp.float32), (0, Cp - Cout))
    beta_p = jnp.pad(beta.astype(jnp.float32), (0, Cp - Cout))
    scale1 = gamma_p * lax.rsqrt(var + EPS)
    shift1 = beta_p - mean * scale1
    scale = scale1.reshape(1, Cp)
    shift = shift1.reshape(1, Cp)
    sc_spec = pl.BlockSpec((1, Cp), lambda i: (0, 0))

    # ---- Pass 2: normalize + affine + LeakyReLU ------------------------------------------
    if recompute:
        out = pl.pallas_call(
            conv_bn_lrelu_kernel,
            out_shape=jax.ShapeDtypeStruct((M_pad, Cp), jnp.bfloat16),
            grid=(num_m,),
            in_specs=[p_spec, w_spec, sc_spec, sc_spec],
            out_specs=pl.BlockSpec((tm, Cp), lambda i: (i, 0)),
            compiler_params=cparams,
            cost_estimate=matmul_cost,
        )(patches, wmat, scale, shift)
    else:
        # Pure elementwise & HBM-bound: decouple from tm, use the largest divisor of num_m
        # that keeps tiles <= 2048 rows; alias the output onto y (in-place bf16 rewrite).
        max_rows = 2048
        d = 1
        for cand in range(num_m, 0, -1):
            if num_m % cand == 0 and tm * cand <= max_rows:
                d = cand
                break
        tm2 = tm * d
        num_m2 = M_pad // tm2
        out = pl.pallas_call(
            bn_lrelu_kernel,
            out_shape=jax.ShapeDtypeStruct((M_pad, Cp), jnp.bfloat16),
            grid=(num_m2,),
            in_specs=[pl.BlockSpec((tm2, Cp), lambda i: (i, 0)), sc_spec, sc_spec],
            out_specs=pl.BlockSpec((tm2, Cp), lambda i: (i, 0)),
            input_output_aliases={0: 0},
            compiler_params=cparams,
        )(y, scale, shift)

    # Slice padding and restore the module's layout / dtype.
    out = out[:M, :Cout].reshape(N, Ho, Wo, Cout).astype(jnp.float32)
    if not output_nhwc:
        out = jnp.transpose(out, (0, 3, 1, 2))      # NHWC -> NCHW (skip when chaining NHWC)
    return out


# --------------------------------- reference & test -------------------------------------

def _reference(x_nchw, weight, bias, gamma, beta, *, stride=2, pad=1):
    """Pure-JAX f32 reference: conv+bias -> training-mode BN -> LeakyReLU(0.2)."""
    y = lax.conv_general_dilated(
        x_nchw, weight, window_strides=(stride, stride),
        padding=((pad, pad), (pad, pad)),
        dimension_numbers=("NCHW", "OIHW", "NCHW"),
    ) + bias[None, :, None, None]
    mean = jnp.mean(y, axis=(0, 2, 3), keepdims=True)
    var = jnp.mean((y - mean) ** 2, axis=(0, 2, 3), keepdims=True)
    y = (y - mean) * lax.rsqrt(var + EPS)
    y = y * gamma[None, :, None, None] + beta[None, :, None, None]
    return jnp.where(y >= 0.0, y, NEG_SLOPE * y)


if __name__ == "__main__":
    key = jax.random.PRNGKey(0)
    k_x, k_w, k_b, k_x2 = jax.random.split(key, 4)

    N, Cin, H, W = 2, 4, 16, 16
    Cout = 8

    x = jax.random.normal(k_x, (N, Cin, H, W), jnp.float32)

    # PyTorch-style init: Conv2d weight/bias ~ U(-1/sqrt(fan_in), +1/sqrt(fan_in))
    fan_in = Cin * 3 * 3
    bound = 1.0 / (fan_in ** 0.5)
    weight = jax.random.uniform(k_w, (Cout, Cin, 3, 3), jnp.float32, -bound, bound)
    bias = jax.random.uniform(k_b, (Cout,), jnp.float32, -bound, bound)
    gamma = jnp.ones((Cout,), jnp.float32)   # BatchNorm2d weight init
    beta = jnp.zeros((Cout,), jnp.float32)   # BatchNorm2d bias init

    # Case 1: module-default small shape; auto config -> recompute (fused conv+BN+LReLU)
    # path, single M-tile.
    y1 = unet_block_down(x, weight, bias, gamma, beta)
    jax.block_until_ready(y1)
    ref1 = _reference(x, weight, bias, gamma, beta)
    assert y1.shape == (N, Cout, H // 2, W // 2)
    assert jnp.max(jnp.abs(y1 - ref1)) < 5e-2      # bf16 MXU operands / bf16 y => relaxed tol

    # Case 2: larger spatial, forced store-y path -> multi-tile stats reduction,
    # bf16 y intermediate, decoupled pass-2 tile, input_output_aliases in-place rewrite.
    x2 = jax.random.normal(k_x2, (N, Cin, 32, 32), jnp.float32)
    y2 = unet_block_down(x2, weight, bias, gamma, beta, tm=256, recompute=False)
    jax.block_until_ready(y2)
    ref2 = _reference(x2, weight, bias, gamma, beta)
    assert y2.shape == (N, Cout, 16, 16)
    assert jnp.max(jnp.abs(y2 - ref2)) < 5e-2

    print("KERNEL_OK")
</pallas_src>

<mosaic_0001>
module attributes {stable_mosaic.version = 11 : i64} {
  func.func @conv_stats_kernel(%arg0: i32, %arg1: memref<256x128xbf16, #tpu.memory_space<vmem>>, %arg2: memref<128x128xbf16, #tpu.memory_space<vmem>>, %arg3: memref<1x2x128xf32, #tpu.memory_space<vmem>>) attributes {dimension_semantics = [#tpu.dimension_semantics<parallel>], iteration_bounds = array<i64: 1>, scalar_prefetch = 0 : i64, scratch_operands = 0 : i64, tpu.core_type = #tpu.core_type<tc>, window_params = [{transform_indices = @transform_0, window_bounds = array<i64: 256, 128>}, {pipeline_mode = #tpu.pipeline_mode<synchronous>, transform_indices = @transform_1, window_bounds = array<i64: 128, 128>}, {transform_indices = @transform_2, window_bounds = array<i64: 1, 2, 128>}]} {
    %c0 = arith.constant 0 : index
    %c0_0 = arith.constant 0 : index
    %0 = vector.load %arg1[%c0, %c0_0] : memref<256x128xbf16, #tpu.memory_space<vmem>>, vector<256x128xbf16>
    %c0_1 = arith.constant 0 : index
    %c0_2 = arith.constant 0 : index
    %1 = vector.load %arg2[%c0_1, %c0_2] : memref<128x128xbf16, #tpu.memory_space<vmem>>, vector<128x128xbf16>
    %cst = arith.constant dense<0.000000e+00> : vector<256x128xf32>
    %2 = tpu.matmul %0, %1, %cst {dimension_numbers = #tpu.dot_dimension_numbers<[1], [0], [0], [1], [0, 0, 1, 1], [], []>} : vector<256x128xbf16>, vector<128x128xbf16>, vector<256x128xf32> -> vector<256x128xf32>
    %cst_3 = arith.constant dense<0.000000e+00> : vector<128xf32>
    %3 = vector.multi_reduction <add>, %2, %cst_3 [0] : vector<256x128xf32> to vector<128xf32>
    %4 = vector.shape_cast %3 : vector<128xf32> to vector<1x128xf32>
    %c0_4 = arith.constant 0 : index
    %c0_5 = arith.constant 0 : index
    %c0_6 = arith.constant 0 : index
    %5 = vector.load %arg3[%c0_4, %c0_5, %c0_6] : memref<1x2x128xf32, #tpu.memory_space<vmem>>, vector<1x1x128xf32>
    %6 = vector.shape_cast %5 : vector<1x1x128xf32> to vector<1x128xf32>
    %7 = vector.shape_cast %4 : vector<1x128xf32> to vector<1x1x128xf32>
    tpu.vector_store %arg3[%c0_4, %c0_5, %c0_6], %7 {strides = array<i32>} : memref<1x2x128xf32, #tpu.memory_space<vmem>>, vector<1x1x128xf32>,
    %8 = arith.mulf %2, %2 : vector<256x128xf32>
    %cst_7 = arith.constant dense<0.000000e+00> : vector<128xf32>
    %9 = vector.multi_reduction <add>, %8, %cst_7 [0] : vector<256x128xf32> to vector<128xf32>
    %10 = vector.shape_cast %9 : vector<128xf32> to vector<1x128xf32>
    %c0_8 = arith.constant 0 : index
    %c1 = arith.constant 1 : index
    %c0_9 = arith.constant 0 : index
    %11 = vector.load %arg3[%c0_8, %c1, %c0_9] : memref<1x2x128xf32, #tpu.memory_space<vmem>>, vector<1x1x128xf32>
    %12 = vector.shape_cast %11 : vector<1x1x128xf32> to vector<1x128xf32>
    %13 = vector.shape_cast %10 : vector<1x128xf32> to vector<1x1x128xf32>
    tpu.vector_store %arg3[%c0_8, %c1, %c0_9], %13 {strides = array<i32>} : memref<1x2x128xf32, #tpu.memory_space<vmem>>, vector<1x1x128xf32>,
    return
  }
  func.func @transform_0(%arg0: i32) -> (i32, i32) {
    %c0_i32 = arith.constant 0 : i32
    %c0_i32_0 = arith.constant 0 : i32
    return %arg0, %c0_i32 : i32, i32
  }
  func.func @transform_1(%arg0: i32) -> (i32, i32) {
    %c0_i32 = arith.constant 0 : i32
    %c0_i32_0 = arith.constant 0 : i32
    %c0_i32_1 = arith.constant 0 : i32
    return %c0_i32, %c0_i32_0 : i32, i32
  }
  func.func @transform_2(%arg0: i32) -> (i32, i32, i32) {
    %c0_i32 = arith.constant 0 : i32
    %c0_i32_0 = arith.constant 0 : i32
    %c0_i32_1 = arith.constant 0 : i32
    return %arg0, %c0_i32, %c0_i32_0 : i32, i32, i32
  }
}

</mosaic_0001>

<bundles_post_ra>
// kernel: tpu_custom_call.1
= control target key start
LH: loop header
LB: loop body
LE: loop exit
PB: predicated region body
PF: predicated region fallthrough
CT: control target
= control target key end

     0   :  { %7 = vsyncpa [#allocation3], 0  ;;  %s774_s0 = inlined_call_operand.hbm [shape: bf16[256,128], index: 0, kind: input, shape index: {}]   ;;  %s775_s1 = inlined_call_operand.hbm [shape: bf16[128,128], index: 1, kind: input, shape index: {}]   ;;  %s776_s2 = inlined_call_operand.hbm [shape: f32[1,2,128], index: 2, kind: output, shape index: {}]  }
   0x1   :  { %8 = vsyncpa [#allocation6], 0 }
   0x2   :  { %9 = vsyncpa [#allocation4], 0  ;;  %s725_s9 = smov [#allocation2]  }
   0x3   :  { %s15_s10 = sshll.u32 %s725_s9, 4  ;;  %s16_s10 = int_to_ptr.vmem [resolvable:$true] %s15_s10 }
   0x4   :  { %s667_s11 = scalar_lea.vmem %s16_s10, 2048  ;;  %p672_p1 = scmp.lt.s32.totalorder %s16_s10, %s16_s10 }
   0x5   :  { %p668_p0 = scmp.ne.s32.totalorder %s16_s10, %s667_s11  ;;  %p673_p2 = scmp.lt.s32.totalorder %s667_s11, %s667_s11 }
   0x7   :  { %p674_p3 = por %p673_p2, %p672_p1 }
   0x9   :  { %p675_p4 = pnand %p674_p3, %p668_p0 }
   0xb   :  { %678 = shalt.err (!%p675_p4)
}
   0xc   :  { %s726_s12 = smov 64   ;;  %s727_s13 = smov 4  }
   0xd   :  { %21 = dma.hbm_to_vmem [thread:$0]  %s774_s0, 2048, %s16_s10, [#allocation3], %s726_s12, %s726_s12, %s727_s13  }
   0xe   :  { %s728_s16 = smov [#allocation5]  }
   0xf   :  { %s27_s17 = sshll.u32 %s728_s16, 4  ;;  %s28_s17 = int_to_ptr.vmem [resolvable:$true] %s27_s17 }
  0x10   :  { %s687_s18 = scalar_lea.vmem %s28_s17, 1024  ;;  %p692_p6 = scmp.lt.s32.totalorder %s28_s17, %s28_s17 }
  0x11   :  { %p688_p5 = scmp.ne.s32.totalorder %s28_s17, %s687_s18  ;;  %p693_p7 = scmp.lt.s32.totalorder %s687_s18, %s687_s18 }
  0x13   :  { %p694_p8 = por %p693_p7, %p692_p6 }
  0x15   :  { %p695_p9 = pnand %p694_p8, %p688_p5 }
  0x17   :  { %698 = shalt.err (!%p695_p9)
}
  0x18   :  { %33 = dma.hbm_to_vmem [thread:$0]  %s775_s1, 1024, %s28_s17, [#allocation6], %s726_s12, %s726_s12, %s727_s13  }
  0x19   :  { %719 = dma.done.wait [#allocation3], 2048  }
  0x1a   :  { %720 = vsyncadd [#allocation3], 4294965248 }
  0x1b   :  { %721 = dma.done.wait [#allocation6], 1024  }
  0x1c   :  { %722 = vsyncadd [#allocation6], 4294966272  ;;  %v635_v0 = vld [vmem:[#allocation5 + $0x38] sm:$0xff]   ;;  %v636_v1 = vld [vmem:[#allocation5 + $0x30] sm:$0xff]   ;;  %s729_s0 = smov [#allocation7]  }
  0x1d   :  { %566 = vmatprep.subr.bf16.mxu0 %v635_v0  ;;  %614 = vmatprep.subr.bf16.mxu1 %v635_v0  ;;  %v637_v2 = vld [vmem:[#allocation5 + $0x28] sm:$0xff]   ;;  %v638_v3 = vld [vmem:[#allocation5 + $0x20] sm:$0xff]   ;;  %v639_v5 = vld [vmem:[#allocation5 + $0x18] sm:$0xff]   ;;  %s508_s1 = sshll.u32 %s729_s0, 4  ;;  %s509_s1 = int_to_ptr.vmem [resolvable:$true] %s508_s1 }
  0x1e   :  { %567 = vmatpush3.bf16.msra.mxu0 %v635_v0  ;;  %622 = vmatpush3.bf16.msra.mxu1 %v635_v0  ;;  %v643_v4 = vld [vmem:[#allocation2] sm:$0xff]   ;;  %v640_v6 = vld [vmem:[#allocation5 + $0x10] sm:$0xff]   ;;  %v641_v8 = vld [vmem:[#allocation5 + $0x8] sm:$0xff]   ;;  %s699_s21 = scalar_lea.vmem %s509_s1, 32  ;;  %p704_p11 = scmp.lt.s32.totalorder %s509_s1, %s509_s1 }
  0x1f   :  { %568 = vmatprep.subr.bf16.mxu0 %v636_v1  ;;  %615 = vmatprep.subr.bf16.mxu1 %v636_v1  ;;  %v651_v7 = vld [vmem:[#allocation2 + $0x40] sm:$0xff]   ;;  %v644_v10 = vld [vmem:[#allocation2 + $0x8] sm:$0xff]   ;;  %v645_v12 = vld [vmem:[#allocation2 + $0x10] sm:$0xff]   ;;  %p700_p10 = scmp.ne.s32.totalorder %s509_s1, %s699_s21  ;;  %p705_p12 = scmp.lt.s32.totalorder %s699_s21, %s699_s21 }
  0x20   :  { %582 = vmatprep.mubr.bf16.mxu0 %v643_v4  ;;  %598 = vmatprep.mubr.bf16.mxu1 %v651_v7  ;;  %v642_v9 = vld [vmem:[#allocation5] sm:$0xff]   ;;  %v652_v11 = vld [vmem:[#allocation2 + $0x48] sm:$0xff]   ;;  %v653_v13 = vld [vmem:[#allocation2 + $0x50] sm:$0xff]  }
  0x21   :  { %v646_v14 = vld [vmem:[#allocation2 + $0x18] sm:$0xff]   ;;  %v647_v16 = vld [vmem:[#allocation2 + $0x20] sm:$0xff]   ;;  %v648_v18 = vld [vmem:[#allocation2 + $0x28] sm:$0xff]   ;;  %p706_p13 = por %p705_p12, %p704_p11 }
  0x22   :  { %569 = vmatpush3.bf16.msra.mxu0 %v636_v1  ;;  %623 = vmatpush3.bf16.msra.mxu1 %v636_v1  ;;  %v654_v15 = vld [vmem:[#allocation2 + $0x58] sm:$0xff]   ;;  %v655_v17 = vld [vmem:[#allocation2 + $0x60] sm:$0xff]   ;;  %v656_v19 = vld [vmem:[#allocation2 + $0x68] sm:$0xff]  }
  0x23   :  { %570 = vmatprep.subr.bf16.mxu0 %v637_v2  ;;  %616 = vmatprep.subr.bf16.mxu1 %v637_v2  ;;  %v649_v20 = vld [vmem:[#allocation2 + $0x30] sm:$0xff]   ;;  %v650_v22 = vld [vmem:[#allocation2 + $0x38] sm:$0xff]   ;;  %p707_p0 = pnand %p706_p13, %p700_p10 }
  0x24   :  { %v657_v21 = vld [vmem:[#allocation2 + $0x70] sm:$0xff]   ;;  %v658_v23 = vld [vmem:[#allocation2 + $0x78] sm:$0xff]  }
  0x26   :  { %571 = vmatpush3.bf16.msra.mxu0 %v637_v2  ;;  %624 = vmatpush3.bf16.msra.mxu1 %v637_v2 }
  0x27   :  { %572 = vmatprep.subr.bf16.mxu0 %v638_v3  ;;  %617 = vmatprep.subr.bf16.mxu1 %v638_v3 }
  0x2a   :  { %573 = vmatpush3.bf16.msra.mxu0 %v638_v3  ;;  %625 = vmatpush3.bf16.msra.mxu1 %v638_v3 }
  0x2b   :  { %574 = vmatprep.subr.bf16.mxu0 %v639_v5  ;;  %618 = vmatprep.subr.bf16.mxu1 %v639_v5 }
  0x2e   :  { %575 = vmatpush3.bf16.msra.mxu0 %v639_v5  ;;  %626 = vmatpush3.bf16.msra.mxu1 %v639_v5 }
  0x2f   :  { %576 = vmatprep.subr.bf16.mxu0 %v640_v6  ;;  %619 = vmatprep.subr.bf16.mxu1 %v640_v6 }
  0x32   :  { %577 = vmatpush3.bf16.msra.mxu0 %v640_v6  ;;  %627 = vmatpush3.bf16.msra.mxu1 %v640_v6 }
  0x33   :  { %578 = vmatprep.subr.bf16.mxu0 %v641_v8  ;;  %620 = vmatprep.subr.bf16.mxu1 %v641_v8 }
  0x36   :  { %579 = vmatpush3.bf16.msra.mxu0 %v641_v8  ;;  %628 = vmatpush3.bf16.msra.mxu1 %v641_v8 }
  0x37   :  { %580 = vmatprep.subr.bf16.mxu0 %v642_v9  ;;  %621 = vmatprep.subr.bf16.mxu1 %v642_v9 }
  0x3a   :  { %581 = vmatpush3.bf16.msra.mxu0 %v642_v9  ;;  %629 = vmatpush3.bf16.msra.mxu1 %v642_v9 }
  0x3d   :  { %583 = vmatmul.mubr.bf16.vlgmr.msra.gmra.mxu0 %v644_v10  ;;  %599 = vmatmul.mubr.bf16.vlgmr.msra.gmra.mxu1 %v652_v11 }
  0x3e   :  { %586 = vmatprep.mubr.bf16.mxu0 %v645_v12  ;;  %602 = vmatprep.mubr.bf16.mxu1 %v653_v13 }
  0x45   :  { %587 = vmatmul.mubr.bf16.gmra.mxu0 %v646_v14  ;;  %603 = vmatmul.mubr.bf16.gmra.mxu1 %v654_v15 }
  0x46   :  { %590 = vmatprep.mubr.bf16.mxu0 %v647_v16  ;;  %606 = vmatprep.mubr.bf16.mxu1 %v655_v17 }
  0x4d   :  { %591 = vmatmul.mubr.bf16.gmra.mxu0 %v648_v18  ;;  %607 = vmatmul.mubr.bf16.gmra.mxu1 %v656_v19 }
  0x4e   :  { %594 = vmatprep.mubr.bf16.mxu0 %v649_v20  ;;  %610 = vmatprep.mubr.bf16.mxu1 %v657_v21 }
  0x55   :  { %595 = vmatmul.mubr.bf16.gmra.mxu0 %v650_v22  ;;  %611 = vmatmul.mubr.bf16.gmra.mxu1 %v658_v23 }
  0xfd   :  { %v584_v24 = vpop.f32.mrf.mxu0  ;;  %v751_v25 = vpop.f32.mrf.mxu1 }
  0xfe   :  { %v434_v35 = vmul.f32 %v584_v24, %v584_v24 }
  0xff   :  { %v267_v26 = vpop.f32.mrf.mxu0  ;;  %v753_v28 = vpop.f32.mrf.mxu1 }
 0x100   :  { %v432_v30 = vmul.f32 %v267_v26, %v267_v26 }
 0x101   :  { %v585_v27 = vpop.f32.mrf.mxu0  ;;  %v755_v34 = vpop.f32.mrf.mxu1 }
 0x102   :  { %v435_v39 = vmul.f32 %v585_v27, %v585_v27 }
 0x103   :  { %v270_v29 = vpop.f32.mrf.mxu0  ;;  %v334_v43 = vpop.f32.mrf.mxu1 }
 0x104   :  { %v394_v31 = vadd.f32 %v270_v29, %v267_v26  ;;  %v433_v32 = vmul.f32 %v270_v29, %v270_v29 }
 0x105   :  { %v588_v33 = vpop.f32.mrf.mxu0  ;;  %v757_v52 = vpop.f32.mrf.mxu1 }
 0x106   :  { %v395_v36 = vadd.f32 %v584_v24, %v394_v31  ;;  %v464_v37 = vadd.f32 %v433_v32, %v432_v30  ;;  %v438_v53 = vmul.f32 %v588_v33, %v588_v33 }
 0x107   :  { %v283_v38 = vpop.f32.mrf.mxu0  ;;  %v347_v61 = vpop.f32.mrf.mxu1 }
 0x108   :  { %v465_v40 = vadd.f32 %v464_v37, %v434_v35  ;;  %v396_v41 = vadd.f32 %v585_v27, %v395_v36  ;;  %v436_v45 = vmul.f32 %v283_v38, %v283_v38 }
 0x109   :  { %v589_v42 = vpop.f32.mrf.mxu0  ;;  %v605_v6 = vpop.f32.mrf.mxu1 }
 0x10a   :  { %v397_v44 = vadd.f32 %v396_v41, %v283_v38  ;;  %v466_v46 = vadd.f32 %v465_v40, %v435_v39  ;;  %v439_v57 = vmul.f32 %v589_v42, %v589_v42  ;;  %v449_v38 = vmul.f32 %v334_v43, %v334_v43 }
 0x10b   :  { %v286_v47 = vpop.f32.mrf.mxu0  ;;  %v350_v15 = vpop.f32.mrf.mxu1  ;;  %v450_v41 = vmul.f32 %v751_v25, %v751_v25 }
 0x10c   :  { %v467_v48 = vadd.f32 %v466_v46, %v436_v45  ;;  %v398_v49 = vadd.f32 %v397_v44, %v286_v47  ;;  %v437_v50 = vmul.f32 %v286_v47, %v286_v47  ;;  %v451_v45 = vmul.f32 %v755_v34, %v755_v34 }
 0x10d   :  { %v592_v51 = vpop.f32.mrf.mxu0  ;;  %v608_v23 = vpop.f32.mrf.mxu1 }
 0x10e   :  { %v399_v54 = vadd.f32 %v588_v33, %v398_v49  ;;  %v468_v55 = vadd.f32 %v467_v48, %v437_v50  ;;  %v442_v7 = vmul.f32 %v592_v51, %v592_v51  ;;  %v448_v33 = vmul.f32 %v753_v28, %v753_v28 }
 0x10f   :  { %v299_v56 = vpop.f32.mrf.mxu0  ;;  %v363_v32 = vpop.f32.mrf.mxu1  ;;  %v452_v50 = vmul.f32 %v347_v61, %v347_v61 }
 0x110   :  { %v469_v58 = vadd.f32 %v468_v55, %v438_v53  ;;  %v400_v59 = vadd.f32 %v589_v42, %v399_v54  ;;  %v440_v63 = vmul.f32 %v299_v56, %v299_v56  ;;  %v453_v53 = vmul.f32 %v350_v15, %v350_v15 }
 0x111   :  { %v593_v60 = vpop.f32.mrf.mxu0  ;;  %v609_v40 = vpop.f32.mrf.mxu1  ;;  %v454_v55 = vmul.f32 %v757_v52, %v757_v52 }
 0x112   :  { %v401_v62 = vadd.f32 %v400_v59, %v299_v56  ;;  %v470_v0 = vadd.f32 %v469_v58, %v439_v57  ;;  %v443_v11 = vmul.f32 %v593_v60, %v593_v60  ;;  %v455_v57 = vmul.f32 %v605_v6, %v605_v6 }
 0x113   :  { %v302_v1 = vpop.f32.mrf.mxu0  ;;  %v366_v48 = vpop.f32.mrf.mxu1 }
 0x114   :  { %v471_v2 = vadd.f32 %v470_v0, %v440_v63  ;;  %v402_v3 = vadd.f32 %v401_v62, %v302_v1  ;;  %v441_v4 = vmul.f32 %v302_v1, %v302_v1  ;;  %v457_v1 = vmul.f32 %v366_v48, %v366_v48 }
 0x115   :  { %v596_v5 = vpop.f32.mrf.mxu0  ;;  %v612_v54 = vpop.f32.mrf.mxu1 }
 0x116   :  { %v403_v8 = vadd.f32 %v592_v51, %v402_v3  ;;  %v472_v9 = vadd.f32 %v471_v2, %v441_v4  ;;  %v446_v24 = vmul.f32 %v596_v5, %v596_v5  ;;  %v458_v3 = vmul.f32 %v608_v23, %v608_v23 }
 0x117   :  { %v315_v10 = vpop.f32.mrf.mxu0 }
 0x118   :  { %v473_v12 = vadd.f32 %v472_v9, %v442_v7  ;;  %v404_v13 = vadd.f32 %v593_v60, %v403_v8  ;;  %v444_v17 = vmul.f32 %v315_v10, %v315_v10  ;;  %v379_v60 = vpop.f32.mrf.mxu1  ;;  %v459_v7 = vmul.f32 %v609_v40, %v609_v40 }
 0x119   :  { %v597_v14 = vpop.f32.mrf.mxu0 }
 0x11a   :  { %v405_v16 = vadd.f32 %v404_v13, %v315_v10  ;;  %v474_v18 = vadd.f32 %v473_v12, %v443_v11  ;;  %v447_v29 = vmul.f32 %v597_v14, %v597_v14  ;;  %v613_v2 = vpop.f32.mrf.mxu1  ;;  %v460_v11 = vmul.f32 %v379_v60, %v379_v60 }
 0x11b   :  { %v318_v19 = vpop.f32.mrf.mxu0 }
 0x11c   :  { %v475_v20 = vadd.f32 %v474_v18, %v444_v17  ;;  %v406_v21 = vadd.f32 %v405_v16, %v318_v19  ;;  %v445_v22 = vmul.f32 %v318_v19, %v318_v19  ;;  %v382_v10 = vpop.f32.mrf.mxu1  ;;  %v463_v18 = vmul.f32 %v613_v2, %v613_v2 }
 0x11e   :  { %v407_v26 = vadd.f32 %v596_v5, %v406_v21  ;;  %v476_v27 = vadd.f32 %v475_v20, %v445_v22 }
 0x120   :  { %v408_v30 = vadd.f32 %v597_v14, %v407_v26  ;;  %v477_v31 = vadd.f32 %v476_v27, %v446_v24  ;;  %v461_v14 = vmul.f32 %v382_v10, %v382_v10 }
 0x122   :  { %v478_v35 = vadd.f32 %v477_v31, %v447_v29  ;;  %v409_v36 = vadd.f32 %v408_v30, %v753_v28 }
 0x124   :  { %v410_v37 = vadd.f32 %v409_v36, %v334_v43  ;;  %v479_v39 = vadd.f32 %v478_v35, %v448_v33 }
 0x126   :  { %v411_v42 = vadd.f32 %v751_v25, %v410_v37  ;;  %v480_v44 = vadd.f32 %v479_v39, %v449_v38 }
 0x128   :  { %v481_v46 = vadd.f32 %v480_v44, %v450_v41  ;;  %v412_v47 = vadd.f32 %v755_v34, %v411_v42  ;;  %v456_v34 = vmul.f32 %v363_v32, %v363_v32 }
 0x12a   :  { %v413_v49 = vadd.f32 %v412_v47, %v347_v61  ;;  %v482_v28 = vadd.f32 %v481_v46, %v451_v45 }
 0x12c   :  { %v483_v51 = vadd.f32 %v482_v28, %v452_v50  ;;  %v414_v43 = vadd.f32 %v413_v49, %v350_v15  ;;  %v462_v15 = vmul.f32 %v612_v54, %v612_v54 }
 0x12e   :  { %v415_v25 = vadd.f32 %v757_v52, %v414_v43  ;;  %v484_v56 = vadd.f32 %v483_v51, %v453_v53 }
 0x130   :  { %v485_v58 = vadd.f32 %v484_v56, %v454_v55  ;;  %v416_v59 = vadd.f32 %v605_v6, %v415_v25 }
 0x132   :  { %v417_v62 = vadd.f32 %v416_v59, %v363_v32  ;;  %v486_v63 = vadd.f32 %v485_v58, %v455_v57 }
 0x134   :  { %v487_v0 = vadd.f32 %v486_v63, %v456_v34  ;;  %v418_v61 = vadd.f32 %v417_v62, %v366_v48 }
 0x136   :  { %v419_v4 = vadd.f32 %v608_v23, %v418_v61  ;;  %v488_v5 = vadd.f32 %v487_v0, %v457_v1 }
 0x138   :  { %v489_v8 = vadd.f32 %v488_v5, %v458_v3  ;;  %v420_v9 = vadd.f32 %v609_v40, %v419_v4 }
 0x13a   :  { %v421_v52 = vadd.f32 %v420_v9, %v379_v60  ;;  %v490_v12 = vadd.f32 %v489_v8, %v459_v7 }
 0x13c   :  { %v491_v13 = vadd.f32 %v490_v12, %v460_v11  ;;  %v422_v6 = vadd.f32 %v421_v52, %v382_v10 }
 0x13e   :  { %v423_v16 = vadd.f32 %v612_v54, %v422_v6  ;;  %v492_v17 = vadd.f32 %v491_v13, %v461_v14 }
 0x140   :  { %v424_v19 = vadd.f32 %v613_v2, %v423_v16  ;;  %v493_v20 = vadd.f32 %v492_v17, %v462_v15 }
 0x142   :  { %v425_v21 = vrot.slane %v424_v19, 4  ;;  %v494_v22 = vadd.f32 %v493_v20, %v463_v18 }
 0x144   :  { %v426_v23 = vadd.f32 %v425_v21, %v424_v19  ;;  %v495_v24 = vrot.slane %v494_v22, 4 }
 0x146   :  { %v427_v26 = vrot.slane %v426_v23, 2  ;;  %v496_v27 = vadd.f32 %v495_v24, %v494_v22 }
 0x148   :  { %v428_v29 = vadd.f32 %v427_v26, %v426_v23  ;;  %v497_v30 = vrot.slane %v496_v27, 2 }
 0x14a   :  { %v429_v31 = vrot.slane %v428_v29, 1  ;;  %v498_v32 = vadd.f32 %v497_v30, %v496_v27 }
 0x14c   :  { %v430_v33 = vadd.f32 %v429_v31, %v428_v29  ;;  %v499_v35 = vrot.slane %v498_v32, 1 }
 0x14e   :  { %431 = vst [vmem:[#allocation7] sm:$0x1] %v430_v33  ;;  %v500_v36 = vadd.f32 %v499_v35, %v498_v32 }
 0x150   :  { %501 = vst [vmem:[#allocation7 + $0x1] sm:$0x1] %v500_v36 }
 0x151   :  { %710 = shalt.err (!%p707_p0)
}
 0x152   :  { %511 = dma.vmem_to_hbm [thread:$0]  %s509_s1, 32, %s776_s2, [#allocation4]  }
 0x153   :  { %723 = dma.done.wait [#allocation4], 32  }
 0x154   :  { %724 = vsyncadd [#allocation4], 4294967264 }
 0x155   :  { %515 = vsyncpa [#allocation3], 1 }
 0x156   :  { %516 = vsyncpa [#allocation6], 1 }
 0x157   :  { %517 = vsyncpa [#allocation4], 1 }

</bundles_post_ra>
